<compile_context>
chip_gen: v7x
topology: tpu7x:2x2x1
jax: 0.10.0
libtpu: 0.0.40
codegen_flags: <defaults>
</compile_context>

<pallas_src>
import jax
import jax.numpy as jnp
from jax import lax
from jax.experimental import pallas as pl
from jax.experimental.pallas import tpu as pltpu

# ---- small, TPU-friendly problem sizes (stand-ins for B, 2048, 7, 7, 256) ----
B = 8          # batch
C_FEAT = 256   # resnet.fc.in_features stand-in (2048 in real resnet101)
H = 8
W = 8
EMBED = 128    # embed_size stand-in (256 in the module)
BN_EPS = 1e-5  # PyTorch BatchNorm1d default eps


def encoder_cnn_kernel(x_ref, w_ref, b_ref, gamma_ref, beta_ref, out_ref, feats_ref):
    """Fused avgpool + linear + batchnorm1d (training-mode batch stats).

    Grid: (num_batch_tiles,)  -- marked "arbitrary" (output / feats are resident).

    x_ref:     (TILE_B, H*W, C_FEAT) f32  trunk output, channels-last (lane axis = C)
    w_ref:     (C_FEAT, EMBED)       f32  linear weight, (in, out) layout, resident
    b_ref:     (1, EMBED)            f32  linear bias
    gamma_ref: (1, EMBED)            f32  BN weight
    beta_ref:  (1, EMBED)            f32  BN bias
    out_ref:   (B, EMBED)            f32  full output, written only at the last step
    feats_ref: (B, EMBED)            f32  VMEM scratch, persists across grid steps
    """
    i = pl.program_id(0)
    tile_b = x_ref.shape[0]

    x = x_ref[...]                                    # (tile_b, HW, C)

    # AdaptiveAvgPool2d((1,1)) + reshape(B, -1): mean over spatial (sublane axis).
    pooled = jnp.mean(x, axis=1)                      # (tile_b, C)

    # Linear: pooled @ W + b  (MXU matmul, f32 accumulate).
    feats = jnp.dot(pooled, w_ref[...],
                    preferred_element_type=jnp.float32) + b_ref[...]   # (tile_b, EMBED)

    # Stash this tile's features into the resident full-batch buffer.
    row0 = pl.multiple_of(i * tile_b, tile_b)
    feats_ref[pl.ds(row0, tile_b), :] = feats

    # Finalize BatchNorm1d over the FULL batch only once, at the last grid step.
    @pl.when(i == pl.num_programs(0) - 1)
    def _():
        f = feats_ref[...]                                             # (B, EMBED)
        mu = jnp.mean(f, axis=0, keepdims=True)                        # (1, EMBED)
        var = jnp.mean((f - mu) ** 2, axis=0, keepdims=True)           # biased var
        inv_std = lax.rsqrt(var + BN_EPS)
        scale = gamma_ref[...] * inv_std                               # (1, EMBED)
        shift = beta_ref[...] - mu * scale                             # (1, EMBED)
        out_ref[...] = f * scale + shift                               # single FMA


def _pick_tile_b(batch, hw, c, budget_bytes=8 * 1024 * 1024):
    """Largest divisor of `batch` whose double-buffered x-block fits the budget."""
    per_sample = hw * c * 4
    max_tile = max(1, budget_bytes // (2 * per_sample))
    tile = 1
    for t in range(1, batch + 1):
        if batch % t == 0 and t <= max_tile:
            tile = t
    return tile


def encoder_cnn_forward(features_nhwc, w, b, gamma, beta, tile_b=None):
    """features_nhwc: (B, H, W, C_FEAT) f32 — output of the (frozen) ResNet trunk.

    Channels-last layout so C is the lane (fast) axis inside the kernel; an NCHW
    checkpoint feature map would need one upstream transpose.
    w is the Linear weight pre-transposed to (in_features, out_features).
    """
    Bn, Hh, Ww, C = features_nhwc.shape
    HW = Hh * Ww
    embed = w.shape[1]

    x = features_nhwc.reshape(Bn, HW, C)             # glue reshape in plain JAX
    b2 = b.reshape(1, -1)
    gamma2 = gamma.reshape(1, -1)
    beta2 = beta.reshape(1, -1)

    if tile_b is None:
        tile_b = _pick_tile_b(Bn, HW, C)
    assert Bn % tile_b == 0, "batch must be divisible by the batch tile"
    grid = (Bn // tile_b,)

    # Size the scoped VMEM from the actual blocks (double-buffered x) with headroom.
    x_block_bytes = tile_b * HW * C * 4
    static_bytes = (C * embed + 3 * embed + 2 * Bn * embed) * 4
    needed = 2 * x_block_bytes + static_bytes
    vmem_limit = int(min(max(2 * needed, 32 * 1024 * 1024), 60 * 1024 * 1024))

    out = pl.pallas_call(
        encoder_cnn_kernel,
        out_shape=jax.ShapeDtypeStruct((Bn, embed), jnp.float32),
        grid=grid,
        in_specs=[
            pl.BlockSpec((tile_b, HW, C), lambda i: (i, 0, 0)),   # batch-tiled feature map
            pl.BlockSpec((C, embed), lambda i: (0, 0)),           # W resident across tiles
            pl.BlockSpec((1, embed), lambda i: (0, 0)),
            pl.BlockSpec((1, embed), lambda i: (0, 0)),
            pl.BlockSpec((1, embed), lambda i: (0, 0)),
        ],
        # Output is resident (constant block index) and written once at the last step.
        out_specs=pl.BlockSpec((Bn, embed), lambda i: (0, 0)),
        scratch_shapes=[pltpu.VMEM((Bn, embed), jnp.float32)],    # full-batch feats
        compiler_params=pltpu.CompilerParams(
            dimension_semantics=("arbitrary",),
            vmem_limit_bytes=vmem_limit,
        ),
    )(x, w, b2, gamma2, beta2)
    return out


if __name__ == "__main__":
    key = jax.random.PRNGKey(0)
    k_x, k_w, k_b = jax.random.split(key, 3)

    # Deterministic synthetic trunk-output feature map, channels-last (NHWC).
    features_nhwc = jax.random.normal(k_x, (B, H, W, C_FEAT), dtype=jnp.float32)

    # Linear(C_FEAT, EMBED) params, PyTorch-style uniform(-1/sqrt(in), 1/sqrt(in)).
    # (PyTorch stores weight as (out, in); here it is pre-transposed to (in, out).)
    bound = 1.0 / (C_FEAT ** 0.5)
    w = jax.random.uniform(k_w, (C_FEAT, EMBED), jnp.float32, -bound, bound)
    b = jax.random.uniform(k_b, (EMBED,), jnp.float32, -bound, bound)

    # BatchNorm1d(EMBED) params (fresh init: gamma=1, beta=0).
    gamma = jnp.ones((EMBED,), jnp.float32)
    beta = jnp.zeros((EMBED,), jnp.float32)

    out = encoder_cnn_forward(features_nhwc, w, b, gamma, beta)
    jax.block_until_ready(out)

    # Pure-JAX reference (same semantics as the PyTorch forward in train mode).
    pooled_ref = jnp.mean(features_nhwc, axis=(1, 2))                # (B, C)
    feats_ref = pooled_ref @ w + b                                   # (B, EMBED)
    mu = feats_ref.mean(0, keepdims=True)
    var = ((feats_ref - mu) ** 2).mean(0, keepdims=True)
    ref = gamma * (feats_ref - mu) * lax.rsqrt(var + BN_EPS) + beta
    assert jnp.allclose(out, ref, atol=1e-4, rtol=1e-4), "mismatch vs reference"

    print("KERNEL_OK")
</pallas_src>

<mosaic_0001>
module attributes {stable_mosaic.version = 11 : i64} {
  func.func @encoder_cnn_kernel(%arg0: i32, %arg1: memref<8x64x256xf32, #tpu.memory_space<vmem>>, %arg2: memref<256x128xf32, #tpu.memory_space<vmem>>, %arg3: memref<1x128xf32, #tpu.memory_space<vmem>>, %arg4: memref<1x128xf32, #tpu.memory_space<vmem>>, %arg5: memref<1x128xf32, #tpu.memory_space<vmem>>, %arg6: memref<8x128xf32, #tpu.memory_space<vmem>>, %arg7: memref<8x128xf32, #tpu.memory_space<vmem>>) attributes {dimension_semantics = [#tpu.dimension_semantics<arbitrary>], iteration_bounds = array<i64: 1>, scalar_prefetch = 0 : i64, scratch_operands = 1 : i64, tpu.core_type = #tpu.core_type<tc>, window_params = [{transform_indices = @transform_0, window_bounds = array<i64: 8, 64, 256>}, {pipeline_mode = #tpu.pipeline_mode<synchronous>, transform_indices = @transform_1, window_bounds = array<i64: 256, 128>}, {pipeline_mode = #tpu.pipeline_mode<synchronous>, transform_indices = @transform_2, window_bounds = array<i64: 1, 128>}, {pipeline_mode = #tpu.pipeline_mode<synchronous>, transform_indices = @transform_3, window_bounds = array<i64: 1, 128>}, {pipeline_mode = #tpu.pipeline_mode<synchronous>, transform_indices = @transform_4, window_bounds = array<i64: 1, 128>}, {pipeline_mode = #tpu.pipeline_mode<synchronous>, transform_indices = @transform_5, window_bounds = array<i64: 8, 128>}]} {
    %c0 = arith.constant 0 : index
    %c0_0 = arith.constant 0 : index
    %c0_1 = arith.constant 0 : index
    %0 = vector.load %arg1[%c0, %c0_0, %c0_1] : memref<8x64x256xf32, #tpu.memory_space<vmem>>, vector<8x64x256xf32>
    %cst = arith.constant dense<0.000000e+00> : vector<8x256xf32>
    %1 = vector.multi_reduction <add>, %0, %cst [1] : vector<8x64x256xf32> to vector<8x256xf32>
    %cst_2 = arith.constant 6.400000e+01 : f32
    %2 = vector.broadcast %cst_2 : f32 to vector<8x256xf32>
    %3 = arith.divf %1, %2 : vector<8x256xf32>
    %c0_3 = arith.constant 0 : index
    %c0_4 = arith.constant 0 : index
    %4 = vector.load %arg2[%c0_3, %c0_4] : memref<256x128xf32, #tpu.memory_space<vmem>>, vector<256x128xf32>
    %cst_5 = arith.constant dense<0.000000e+00> : vector<8x128xf32>
    %5 = tpu.matmul %3, %4, %cst_5 {dimension_numbers = #tpu.dot_dimension_numbers<[1], [0], [0], [1], [0, 0, 1, 1], [], []>} : vector<8x256xf32>, vector<256x128xf32>, vector<8x128xf32> -> vector<8x128xf32>
    %c0_6 = arith.constant 0 : index
    %c0_7 = arith.constant 0 : index
    %6 = vector.load %arg3[%c0_6, %c0_7] : memref<1x128xf32, #tpu.memory_space<vmem>>, vector<1x128xf32>
    %7 = vector.broadcast %6 : vector<1x128xf32> to vector<8x128xf32>
    %8 = arith.addf %5, %7 : vector<8x128xf32>
    %c8_i32 = arith.constant 8 : i32
    %9 = arith.muli %arg0, %c8_i32 : i32
    %10 = tpu.assume_multiple %9, 8 : i32
    %11 = arith.index_cast %10 : i32 to index
    %c0_8 = arith.constant 0 : index
    %12 = vector.load %arg7[%11, %c0_8] : memref<8x128xf32, #tpu.memory_space<vmem>>, vector<8x128xf32>
    tpu.vector_store %arg7[%11, %c0_8], %8 {strides = array<i32>} : memref<8x128xf32, #tpu.memory_space<vmem>>, vector<8x128xf32>,
    %c0_i32 = arith.constant 0 : i32
    %13 = arith.cmpi eq, %arg0, %c0_i32 : i32
    %14 = arith.extui %13 : i1 to i32
    %c0_i32_9 = arith.constant 0 : i32
    %15 = arith.cmpi ne, %14, %c0_i32_9 : i32
    scf.if %15 {
      %c0_10 = arith.constant 0 : index
      %c0_11 = arith.constant 0 : index
      %16 = vector.load %arg7[%c0_10, %c0_11] : memref<8x128xf32, #tpu.memory_space<vmem>>, vector<8x128xf32>
      %cst_12 = arith.constant dense<0.000000e+00> : vector<128xf32>
      %17 = vector.multi_reduction <add>, %16, %cst_12 [0] : vector<8x128xf32> to vector<128xf32>
      %18 = vector.shape_cast %17 : vector<128xf32> to vector<1x128xf32>
      %cst_13 = arith.constant 8.000000e+00 : f32
      %19 = vector.broadcast %cst_13 : f32 to vector<1x128xf32>
      %20 = arith.divf %18, %19 : vector<1x128xf32>
      %21 = vector.broadcast %20 : vector<1x128xf32> to vector<8x128xf32>
      %22 = arith.subf %16, %21 : vector<8x128xf32>
      %23 = arith.mulf %22, %22 : vector<8x128xf32>
      %cst_14 = arith.constant dense<0.000000e+00> : vector<128xf32>
      %24 = vector.multi_reduction <add>, %23, %cst_14 [0] : vector<8x128xf32> to vector<128xf32>
      %25 = vector.shape_cast %24 : vector<128xf32> to vector<1x128xf32>
      %cst_15 = arith.constant 8.000000e+00 : f32
      %26 = vector.broadcast %cst_15 : f32 to vector<1x128xf32>
      %27 = arith.divf %25, %26 : vector<1x128xf32>
      %cst_16 = arith.constant 9.99999974E-6 : f32
      %28 = vector.broadcast %cst_16 : f32 to vector<1x128xf32>
      %29 = arith.addf %27, %28 : vector<1x128xf32>
      %30 = math.rsqrt %29 : vector<1x128xf32>
      %c0_17 = arith.constant 0 : index
      %c0_18 = arith.constant 0 : index
      %31 = vector.load %arg4[%c0_17, %c0_18] : memref<1x128xf32, #tpu.memory_space<vmem>>, vector<1x128xf32>
      %32 = arith.mulf %31, %30 : vector<1x128xf32>
      %c0_19 = arith.constant 0 : index
      %c0_20 = arith.constant 0 : index
      %33 = vector.load %arg5[%c0_19, %c0_20] : memref<1x128xf32, #tpu.memory_space<vmem>>, vector<1x128xf32>
      %34 = arith.mulf %20, %32 : vector<1x128xf32>
      %35 = arith.subf %33, %34 : vector<1x128xf32>
      %36 = vector.broadcast %32 : vector<1x128xf32> to vector<8x128xf32>
      %37 = arith.mulf %16, %36 : vector<8x128xf32>
      %38 = vector.broadcast %35 : vector<1x128xf32> to vector<8x128xf32>
      %39 = arith.addf %37, %38 : vector<8x128xf32>
      %c0_21 = arith.constant 0 : index
      %c0_22 = arith.constant 0 : index
      %40 = vector.load %arg6[%c0_21, %c0_22] : memref<8x128xf32, #tpu.memory_space<vmem>>, vector<8x128xf32>
      tpu.vector_store %arg6[%c0_21, %c0_22], %39 {strides = array<i32>} : memref<8x128xf32, #tpu.memory_space<vmem>>, vector<8x128xf32>,
    } else {
    }
    return
  }
  func.func @transform_0(%arg0: i32) -> (i32, i32, i32) {
    %c0_i32 = arith.constant 0 : i32
    %c0_i32_0 = arith.constant 0 : i32
    %c0_i32_1 = arith.constant 0 : i32
    return %arg0, %c0_i32, %c0_i32_0 : i32, i32, i32
  }
  func.func @transform_1(%arg0: i32) -> (i32, i32) {
    %c0_i32 = arith.constant 0 : i32
    %c0_i32_0 = arith.constant 0 : i32
    %c0_i32_1 = arith.constant 0 : i32
    return %c0_i32, %c0_i32_0 : i32, i32
  }
  func.func @transform_2(%arg0: i32) -> (i32, i32) {
    %c0_i32 = arith.constant 0 : i32
    %c0_i32_0 = arith.constant 0 : i32
    %c0_i32_1 = arith.constant 0 : i32
    return %c0_i32, %c0_i32_0 : i32, i32
  }
  func.func @transform_3(%arg0: i32) -> (i32, i32) {
    %c0_i32 = arith.constant 0 : i32
    %c0_i32_0 = arith.constant 0 : i32
    %c0_i32_1 = arith.constant 0 : i32
    return %c0_i32, %c0_i32_0 : i32, i32
  }
  func.func @transform_4(%arg0: i32) -> (i32, i32) {
    %c0_i32 = arith.constant 0 : i32
    %c0_i32_0 = arith.constant 0 : i32
    %c0_i32_1 = arith.constant 0 : i32
    return %c0_i32, %c0_i32_0 : i32, i32
  }
  func.func @transform_5(%arg0: i32) -> (i32, i32) {
    %c0_i32 = arith.constant 0 : i32
    %c0_i32_0 = arith.constant 0 : i32
    %c0_i32_1 = arith.constant 0 : i32
    return %c0_i32, %c0_i32_0 : i32, i32
  }
}

</mosaic_0001>

<bundles_post_ra>
// kernel: tpu_custom_call.1
= control target key start
LH: loop header
LB: loop body
LE: loop exit
PB: predicated region body
PF: predicated region fallthrough
CT: control target
= control target key end

     0   :  { %10 = vsyncpa [#allocation4], 0  ;;  %s873_s0 = inlined_call_operand.hbm [shape: f32[8,64,256], index: 0, kind: input, shape index: {}]   ;;  %s874_s1 = inlined_call_operand.hbm [shape: f32[256,128], index: 1, kind: input, shape index: {}]   ;;  %s875_s2 = inlined_call_operand.vmem [shape: f32[1,128], index: 2, kind: input, shape index: {}]   ;;  %s876_s3 = inlined_call_operand.vmem [shape: f32[1,128], index: 3, kind: input, shape index: {}]   ;;  %s877_s4 = inlined_call_operand.vmem [shape: f32[1,128], index: 4, kind: input, shape index: {}]   ;;  %s878_s5 = inlined_call_operand.hbm [shape: f32[8,128], index: 5, kind: output, shape index: {}]  }
   0x1   :  { %11 = vsyncpa [#allocation7], 0 }
   0x2   :  { %12 = vsyncpa [#allocation5], 0  ;;  %s762_s18 = smov [#allocation3]   ;;  %s690_s22 = scalar_lea.hbm %s873_s0, 16384 }
   0x3   :  { %s18_s19 = sshll.u32 %s762_s18, 4  ;;  %p691_p0 = scmp.ne.s32.totalorder %s873_s0, %s690_s22  ;;  %s19_s19 = int_to_ptr.vmem [resolvable:$true] %s18_s19 }
   0x4   :  { %p694_p1 = scmp.lt.u32.totalorder %s690_s22, %s873_s0 }
   0x6   :  { %p696_p2 = pnand %p694_p1, %p691_p0 }
   0x8   :  { %699 = shalt.err (!%p696_p2)
}
   0x9   :  { %s700_s27 = scalar_lea.vmem %s19_s19, 16384  ;;  %p705_p4 = scmp.lt.s32.totalorder %s19_s19, %s19_s19 }
   0xa   :  { %p701_p3 = scmp.ne.s32.totalorder %s19_s19, %s700_s27  ;;  %p706_p5 = scmp.lt.s32.totalorder %s700_s27, %s700_s27 }
   0xc   :  { %p707_p6 = por %p706_p5, %p705_p4 }
   0xe   :  { %p708_p7 = pnand %p707_p6, %p701_p3 }
  0x10   :  { %711 = shalt.err (!%p708_p7)
}
  0x11   :  { %s763_s28 = smov 256   ;;  %s764_s29 = smov 16  }
  0x12   :  { %24 = dma.hbm_to_vmem [thread:$0]  %s873_s0, 16384, %s19_s19, [#allocation4], %s763_s28, %s763_s28, %s764_s29  }
  0x13   :  { %s765_s7 = smov [#allocation6]   ;;  %s712_s11 = scalar_lea.hbm %s874_s1, 4096 }
  0x14   :  { %s30_s8 = sshll.u32 %s765_s7, 4  ;;  %p713_p8 = scmp.ne.s32.totalorder %s874_s1, %s712_s11  ;;  %s31_s8 = int_to_ptr.vmem [resolvable:$true] %s30_s8 }
  0x15   :  { %p716_p9 = scmp.lt.u32.totalorder %s712_s11, %s874_s1 }
  0x17   :  { %p718_p10 = pnand %p716_p9, %p713_p8 }
  0x19   :  { %721 = shalt.err (!%p718_p10)
}
  0x1a   :  { %s722_s16 = scalar_lea.vmem %s31_s8, 4096  ;;  %p727_p12 = scmp.lt.s32.totalorder %s31_s8, %s31_s8 }
  0x1b   :  { %p723_p11 = scmp.ne.s32.totalorder %s31_s8, %s722_s16  ;;  %p728_p13 = scmp.lt.s32.totalorder %s722_s16, %s722_s16 }
  0x1d   :  { %p729_p0 = por %p728_p13, %p727_p12 }
  0x1f   :  { %p730_p1 = pnand %p729_p0, %p723_p11 }
  0x21   :  { %733 = shalt.err (!%p730_p1)
}
  0x22   :  { %s766_s0 = smov 128   ;;  %s767_s17 = smov 8  }
  0x23   :  { %36 = dma.hbm_to_vmem [thread:$0]  %s874_s1, 4096, %s31_s8, [#allocation7], %s766_s0, %s766_s0, %s767_s17  }
  0x24   :  { %756 = dma.done.wait [#allocation4], 16384  }
  0x25   :  { %757 = vsyncadd [#allocation4], 4294950912 }
  0x26   :  { %758 = dma.done.wait [#allocation7], 4096  }
  0x27   :  { %759 = vsyncadd [#allocation7], 4294963200  ;;  %v418_v0 = vld [vmem:[#allocation6 + $0x80] sm:$0xff]  ;;  %v419_v1 = vld [vmem:[#allocation6 + $0x88] sm:$0xff]  ;;  %vm457_vm0 = vcmask 1041409   ;;  %vm459_vm1 = vcmask 1042434  }
  0x28   :  { %v402_v2 = vld [vmem:[#allocation6] sm:$0xff]  ;;  %v649_v3 = vpack.c.bf16 %v419_v1, %v418_v0  ;;  %v403_v4 = vld [vmem:[#allocation6 + $0x8] sm:$0xff]  ;;  %v420_v5 = vld [vmem:[#allocation6 + $0x90] sm:$0xff]  ;;  %vm461_vm2 = vcmask 1043459   ;;  %vm463_vm3 = vcmask 1044484   ;;  %vm465_vm4 = vcmask 1045509  }
  0x29   :  { %v421_v6 = vld [vmem:[#allocation6 + $0x98] sm:$0xff]  ;;  %v651_v7 = vpack.c.bf16 %v403_v4, %v402_v2  ;;  %v404_v9 = vld [vmem:[#allocation6 + $0x10] sm:$0xff]  ;;  %v422_v11 = vld [vmem:[#allocation6 + $0xa0] sm:$0xff]  ;;  %vm467_vm5 = vcmask 1046534   ;;  %vm469_vm6 = vcmask 1047559   ;;  %s768_s24 = smov [#allocation8]  }
  0x2a   :  { %v653_v8 = vpack.c.bf16 %v421_v6, %v420_v5  ;;  %v405_v10 = vld [vmem:[#allocation6 + $0x18] sm:$0xff]  ;;  %650 = vmatprep.subr.bf16.mxu0 %v649_v3  ;;  %v423_v12 = vld [vmem:[#allocation6 + $0xa8] sm:$0xff]  ;;  %v406_v15 = vld [vmem:[#allocation6 + $0x20] sm:$0xff]  ;;  %s603_s25 = sshll.u32 %s768_s24, 4  ;;  %s604_s25 = int_to_ptr.vmem [resolvable:$true] %s603_s25 }
  0x2b   :  { %652 = vmatpush3.bf16.msra.mxu0 %v651_v7  ;;  %v655_v13 = vpack.c.bf16 %v405_v10, %v404_v9  ;;  %v657_v14 = vpack.c.bf16 %v423_v12, %v422_v11  ;;  %v407_v16 = vld [vmem:[#allocation6 + $0x28] sm:$0xff]  ;;  %v424_v17 = vld [vmem:[#allocation6 + $0xb0] sm:$0xff]  ;;  %v425_v18 = vld [vmem:[#allocation6 + $0xb8] sm:$0xff]  ;;  %s734_s26 = scalar_lea.vmem %s604_s25, 128  ;;  %p739_p3 = scmp.lt.s32.totalorder %s604_s25, %s604_s25 }
  0x2c   :  { %654 = vmatprep.subr.bf16.mxu0 %v653_v8  ;;  %v659_v19 = vpack.c.bf16 %v407_v16, %v406_v15  ;;  %v661_v20 = vpack.c.bf16 %v425_v18, %v424_v17  ;;  %v408_v21 = vld [vmem:[#allocation6 + $0x30] sm:$0xff]  ;;  %v409_v22 = vld [vmem:[#allocation6 + $0x38] sm:$0xff]  ;;  %v426_v23 = vld [vmem:[#allocation6 + $0xc0] sm:$0xff]  ;;  %p735_p2 = scmp.ne.s32.totalorder %s604_s25, %s734_s26  ;;  %p740_p4 = scmp.lt.s32.totalorder %s734_s26, %s734_s26 }
  0x2d   :  { %v427_v24 = vld [vmem:[#allocation6 + $0xc8] sm:$0xff]  ;;  %v52_v26 = vld [vmem:[#allocation3 + $0x18] sm:$0xff]  ;;  %v663_v28 = vpack.c.bf16 %v409_v22, %v408_v21  ;;  %v410_v29 = vld [vmem:[#allocation6 + $0x40] sm:$0xff] }
  0x2e   :  { %v50_v25 = vld [vmem:[#allocation3 + $0x8] sm:$0xff]  ;;  %v665_v32 = vpack.c.bf16 %v427_v24, %v426_v23  ;;  %v56_v33 = vld [vmem:[#allocation3 + $0x38] sm:$0xff]  ;;  %v428_v36 = vld [vmem:[#allocation6 + $0xd0] sm:$0xff]  ;;  %p741_p5 = por %p740_p4, %p739_p3 }
  0x2f   :  { %656 = vmatpush3.bf16.msra.mxu0 %v655_v13  ;;  %v54_v27 = vld [vmem:[#allocation3 + $0x28] sm:$0xff]  ;;  %v190_v31 = vadd.f32 %v52_v26, %v50_v25  ;;  %v68_v35 = vld [vmem:[#allocation3 + $0x98] sm:$0xff]  ;;  %v412_v41 = vld [vmem:[#allocation6 + $0x50] sm:$0xff] }
  0x30   :  { %658 = vmatprep.subr.bf16.mxu0 %v657_v14  ;;  %v411_v30 = vld [vmem:[#allocation6 + $0x48] sm:$0xff]  ;;  %v429_v37 = vld [vmem:[#allocation6 + $0xd8] sm:$0xff]  ;;  %v430_v46 = vld [vmem:[#allocation6 + $0xe0] sm:$0xff]  ;;  %p742_p6 = pnand %p741_p5, %p735_p2 }
  0x31   :  { %v66_v34 = vld [vmem:[#allocation3 + $0x88] sm:$0xff]  ;;  %v191_v39 = vadd.f32 %v190_v31, %v54_v27  ;;  %v413_v42 = vld [vmem:[#allocation6 + $0x58] sm:$0xff]  ;;  %v667_v45 = vpack.c.bf16 %v411_v30, %v410_v29  ;;  %v669_v52 = vpack.c.bf16 %v429_v37, %v428_v36  ;;  %v823_v57 = vld [vmem:[#allocation6 + $0x60] sm:$0xff] }
  0x32   :  { %v70_v38 = vld [vmem:[#allocation3 + $0xa8] sm:$0xff]  ;;  %v216_v40 = vadd.f32 %v68_v35, %v66_v34  ;;  %v72_v44 = vld [vmem:[#allocation3 + $0xb8] sm:$0xff]  ;;  %v671_v4 = vpack.c.bf16 %v413_v42, %v412_v41  ;;  %v827_v5 = vld [vmem:[#allocation6 + $0xf0] sm:$0xff] }
  0x33   :  { %660 = vmatpush3.bf16.msra.mxu0 %v659_v19  ;;  %v58_v43 = vld [vmem:[#allocation3 + $0x48] sm:$0xff]  ;;  %v84_v48 = vld [vmem:[#allocation3 + $0x118] sm:$0xff]  ;;  %v192_v50 = vadd.f32 %v191_v39, %v56_v33  ;;  %v829_v18 = vld [vmem:[#allocation6 + $0x70] sm:$0xff] }
  0x34   :  { %662 = vmatprep.subr.bf16.mxu0 %v661_v20  ;;  %v82_v47 = vld [vmem:[#allocation3 + $0x108] sm:$0xff]  ;;  %v217_v51 = vadd.f32 %v216_v40, %v70_v38  ;;  %v60_v54 = vld [vmem:[#allocation3 + $0x58] sm:$0xff] }
  0x35   :  { %v86_v49 = vld [vmem:[#allocation3 + $0x128] sm:$0xff]  ;;  %v242_v56 = vadd.f32 %v84_v48, %v82_v47  ;;  %v88_v60 = vld [vmem:[#allocation3 + $0x138] sm:$0xff]  ;;  %v193_v62 = vadd.f32 %v192_v50, %v58_v43 }
  0x36   :  { %v431_v53 = vld [vmem:[#allocation6 + $0xe8] sm:$0xff]  ;;  %v218_v63 = vadd.f32 %v217_v51, %v72_v44  ;;  %v76_v0 = vld [vmem:[#allocation3 + $0xd8] sm:$0xff] }
  0x37   :  { %664 = vmatpush3.bf16.msra.mxu0 %v663_v28  ;;  %v74_v55 = vld [vmem:[#allocation3 + $0xc8] sm:$0xff]  ;;  %v100_v1 = vld [vmem:[#allocation3 + $0x198] sm:$0xff]  ;;  %v243_v3 = vadd.f32 %v242_v56, %v86_v49  ;;  %v194_v10 = vadd.f32 %v193_v62, %v60_v54  ;;  %v673_v13 = vpack.c.bf16 %v431_v53, %v430_v46 }
  0x38   :  { %666 = vmatprep.subr.bf16.mxu0 %v665_v32  ;;  %v825_v58 = vld [vmem:[#allocation6 + $0x68] sm:$0xff]  ;;  %v433_v6 = vld [vmem:[#allocation6 + $0xf8] sm:$0xff]  ;;  %v219_v11 = vadd.f32 %v218_v63, %v74_v55 }
  0x39   :  { %v62_v59 = vld [vmem:[#allocation3 + $0x68] sm:$0xff]  ;;  %v64_v7 = vld [vmem:[#allocation3 + $0x78] sm:$0xff]  ;;  %v244_v17 = vadd.f32 %v243_v3, %v88_v60  ;;  %v675_v27 = vpack.c.bf16 %v825_v58, %v823_v57  ;;  %v677_v39 = vpack.c.bf16 %v433_v6, %v827_v5 }
  0x3a   :  { %v98_v61 = vld [vmem:[#allocation3 + $0x188] sm:$0xff]  ;;  %v104_v14 = vld [vmem:[#allocation3 + $0x1b8] sm:$0xff]  ;;  %v195_v23 = vadd.f32 %v194_v10, %v62_v59  ;;  %v220_v24 = vadd.f32 %v219_v11, %v76_v0 }
  0x3b   :  { %v102_v2 = vld [vmem:[#allocation3 + $0x1a8] sm:$0xff]  ;;  %668 = vmatpush3.bf16.msra.mxu0 %v667_v45  ;;  %v268_v12 = vadd.f32 %v100_v1, %v98_v61  ;;  %v116_v16 = vld [vmem:[#allocation3 + $0x218] sm:$0xff] }
  0x3c   :  { %v78_v8 = vld [vmem:[#allocation3 + $0xe8] sm:$0xff]  ;;  %670 = vmatprep.subr.bf16.mxu0 %v669_v52  ;;  %v831_v19 = vld [vmem:[#allocation6 + $0x78] sm:$0xff]  ;;  %v196_v35 = vadd.f32 %v195_v23, %v64_v7 }
  0x3d   :  { %v90_v9 = vld [vmem:[#allocation3 + $0x148] sm:$0xff]  ;;  %v80_v20 = vld [vmem:[#allocation3 + $0xf8] sm:$0xff]  ;;  %v269_v25 = vadd.f32 %v268_v12, %v102_v2  ;;  %v221_v36 = vadd.f32 %v220_v24, %v78_v8  ;;  %v679_v51 = vpack.c.bf16 %v831_v19, %v829_v18 }
  0x3e   :  { %v114_v15 = vld [vmem:[#allocation3 + $0x208] sm:$0xff]  ;;  %v92_v21 = vld [vmem:[#allocation3 + $0x158] sm:$0xff]  ;;  %v245_v31 = vadd.f32 %v244_v17, %v90_v9  ;;  %v197_v47 = vrot.slane %v196_v35, 4 }
  0x3f   :  { %v118_v22 = vld [vmem:[#allocation3 + $0x228] sm:$0xff]  ;;  %v294_v26 = vadd.f32 %v116_v16, %v114_v15  ;;  %v120_v30 = vld [vmem:[#allocation3 + $0x238] sm:$0xff]  ;;  %672 = vmatpush3.bf16.msra.mxu0 %v671_v4  ;;  %v270_v37 = vadd.f32 %v269_v25, %v104_v14  ;;  %v222_v48 = vadd.f32 %v221_v36, %v80_v20 }
  0x40   :  { %v94_v28 = vld [vmem:[#allocation3 + $0x168] sm:$0xff]  ;;  %v132_v33 = vld [vmem:[#allocation3 + $0x298] sm:$0xff]  ;;  %674 = vmatprep.subr.bf16.mxu0 %v673_v13  ;;  %v246_v42 = vadd.f32 %v245_v31, %v92_v21  ;;  %v198_v60 = vadd.f32 %v197_v47, %v196_v35 }
  0x41   :  { %v106_v29 = vld [vmem:[#allocation3 + $0x1c8] sm:$0xff]  ;;  %v295_v38 = vadd.f32 %v294_v26, %v118_v22  ;;  %v108_v40 = vld [vmem:[#allocation3 + $0x1d8] sm:$0xff]  ;;  %v223_v61 = vrot.slane %v222_v48, 4 }
  0x42   :  { %v130_v32 = vld [vmem:[#allocation3 + $0x288] sm:$0xff]  ;;  %v96_v44 = vld [vmem:[#allocation3 + $0x178] sm:$0xff]  ;;  %v271_v49 = vadd.f32 %v270_v37, %v106_v29  ;;  %v247_v55 = vadd.f32 %v246_v42, %v94_v28  ;;  %v199_v9 = vrot.slane %v198_v60, 2 }
  0x43   :  { %v134_v34 = vld [vmem:[#allocation3 + $0x2a8] sm:$0xff]  ;;  %v320_v43 = vadd.f32 %v132_v33, %v130_v32  ;;  %v136_v45 = vld [vmem:[#allocation3 + $0x2b8] sm:$0xff]  ;;  %v296_v50 = vadd.f32 %v295_v38, %v120_v30  ;;  %676 = vmatpush3.bf16.msra.mxu0 %v675_v27  ;;  %v224_v10 = vadd.f32 %v223_v61, %v222_v48 }
  0x44   :  { %v122_v41 = vld [vmem:[#allocation3 + $0x248] sm:$0xff]  ;;  %v124_v53 = vld [vmem:[#allocation3 + $0x258] sm:$0xff]  ;;  %v272_v62 = vadd.f32 %v271_v49, %v108_v40  ;;  %678 = vmatprep.subr.bf16.mxu0 %v677_v39  ;;  %v248_v3 = vadd.f32 %v247_v55, %v96_v44  ;;  %v200_v21 = vadd.f32 %v199_v9, %v198_v60  ;;  %v65_v9 = vld [vmem:[#allocation3 + $0x80] sm:$0xff] }
  0x45   :  { %v146_v46 = vld [vmem:[#allocation3 + $0x308] sm:$0xff]  ;;  %v148_v54 = vld [vmem:[#allocation3 + $0x318] sm:$0xff]  ;;  %v321_v56 = vadd.f32 %v320_v43, %v134_v34  ;;  %v297_v63 = vadd.f32 %v296_v50, %v122_v41  ;;  %v225_v22 = vrot.slane %v224_v10, 2  ;;  %v49_v50 = vld [vmem:[#allocation3] sm:$0xff] }
  0x46   :  { %v110_v52 = vld [vmem:[#allocation3 + $0x1e8] sm:$0xff]  ;;  %v112_v57 = vld [vmem:[#allocation3 + $0x1f8] sm:$0xff]  ;;  %v346_v5 = vadd.f32 %v148_v54, %v146_v46  ;;  %v249_v14 = vrot.slane %v248_v3, 4  ;;  %v201_v32 = vrot.slane %v200_v21, 1 }
  0x47   :  { %v138_v58 = vld [vmem:[#allocation3 + $0x2c8] sm:$0xff]  ;;  %v164_v2 = vld [vmem:[#allocation3 + $0x398] sm:$0xff]  ;;  %v322_v4 = vadd.f32 %v321_v56, %v136_v45  ;;  %v273_v11 = vadd.f32 %v272_v62, %v110_v52  ;;  %v298_v12 = vadd.f32 %v297_v63, %v124_v53  ;;  %680 = vmatpush3.bf16.msra.mxu0 %v679_v51  ;;  %v226_v33 = vadd.f32 %v225_v22, %v224_v10  ;;  %v51_v51 = vld [vmem:[#allocation3 + $0x10] sm:$0xff] }
  0x48   :  { %v150_v59 = vld [vmem:[#allocation3 + $0x328] sm:$0xff]  ;;  %v140_v6 = vld [vmem:[#allocation3 + $0x2d8] sm:$0xff]  ;;  %v250_v25 = vadd.f32 %v249_v14, %v248_v3  ;;  %v202_v42 = vadd.f32 %v201_v32, %v200_v21  ;;  %v53_v62 = vld [vmem:[#allocation3 + $0x20] sm:$0xff]  ;;  %v177_v3 = vadd.f32 %v51_v51, %v49_v50 }
  0x49   :  { %v126_v0 = vld [vmem:[#allocation3 + $0x268] sm:$0xff]  ;;  %v152_v7 = vld [vmem:[#allocation3 + $0x338] sm:$0xff]  ;;  %v323_v15 = vadd.f32 %v322_v4, %v138_v58  ;;  %v347_v16 = vadd.f32 %v346_v5, %v150_v59  ;;  %v274_v23 = vadd.f32 %v273_v11, %v112_v57  ;;  %v227_v43 = vrot.slane %v226_v33, 1  ;;  %v67_v10 = vld [vmem:[#allocation3 + $0x90] sm:$0xff] }
  0x4a   :  { %v162_v1 = vld [vmem:[#allocation3 + $0x388] sm:$0xff]  ;;  %v128_v13 = vld [vmem:[#allocation3 + $0x278] sm:$0xff]  ;;  %v299_v24 = vadd.f32 %v298_v12, %v126_v0  ;;  %v251_v36 = vrot.slane %v250_v25, 2  ;;  %v387_v57 = vmul.f32 0.015625, %v202_v42  ;;  %v178_v14 = vadd.f32 %v177_v3, %v53_v62  ;;  %v71_v32 = vld [vmem:[#allocation3 + $0xb0] sm:$0xff] }
  0x4b   :  { %v166_v8 = vld [vmem:[#allocation3 + $0x3a8] sm:$0xff]  ;;  %v372_v17 = vadd.f32 %v164_v2, %v162_v1  ;;  %v168_v20 = vld [vmem:[#allocation3 + $0x3b8] sm:$0xff]  ;;  %v324_v26 = vadd.f32 %v323_v15, %v140_v6  ;;  %v348_v27 = vadd.f32 %v347_v16, %v152_v7  ;;  %v275_v34 = vrot.slane %v274_v23, 4  ;;  %v73_v42 = vld [vmem:[#allocation3 + $0xc0] sm:$0xff] }
  0x4c   :  { %v142_v18 = vld [vmem:[#allocation3 + $0x2e8] sm:$0xff]  ;;  %v144_v29 = vld [vmem:[#allocation3 + $0x2f8] sm:$0xff]  ;;  %v300_v35 = vadd.f32 %v299_v24, %v128_v13  ;;  %v252_v46 = vadd.f32 %v251_v36, %v250_v25  ;;  %v228_v54 = vadd.f32 %v227_v43, %v226_v33  ;;  %v83_v24 = vld [vmem:[#allocation3 + $0x110] sm:$0xff] }
  0x4d   :  { %v154_v19 = vld [vmem:[#allocation3 + $0x348] sm:$0xff]  ;;  %v373_v28 = vadd.f32 %v372_v17, %v166_v8  ;;  %v156_v30 = vld [vmem:[#allocation3 + $0x358] sm:$0xff]  ;;  %v325_v37 = vadd.f32 %v324_v26, %v142_v18  ;;  %v276_v44 = vadd.f32 %v275_v34, %v274_v23  ;;  %v55_v8 = vld [vmem:[#allocation3 + $0x30] sm:$0xff]  ;;  %v203_v26 = vadd.f32 %v67_v10, %v65_v9 }
  0x4e   :  { %v170_v31 = vld [vmem:[#allocation3 + $0x3c8] sm:$0xff]  ;;  %v349_v38 = vadd.f32 %v348_v27, %v154_v19  ;;  %v172_v41 = vld [vmem:[#allocation3 + $0x3d8] sm:$0xff]  ;;  %v301_v45 = vrot.slane %v300_v35, 4  ;;  %v253_v58 = vrot.slane %v252_v46, 1  ;;  %v389_v2 = vmul.f32 0.015625, %v228_v54  ;;  %v57_v19 = vld [vmem:[#allocation3 + $0x40] sm:$0xff] }
  0x4f   :  { %v374_v39 = vadd.f32 %v373_v28, %v168_v20  ;;  %v158_v40 = vld [vmem:[#allocation3 + $0x368] sm:$0xff]  ;;  %v326_v47 = vadd.f32 %v325_v37, %v144_v29  ;;  %v160_v52 = vld [vmem:[#allocation3 + $0x378] sm:$0xff]  ;;  %v277_v55 = vrot.slane %v276_v44, 2  ;;  %v69_v20 = vld [vmem:[#allocation3 + $0xa0] sm:$0xff]  ;;  %v179_v25 = vadd.f32 %v178_v14, %v55_v8 }
  0x50   :  { %v350_v48 = vadd.f32 %v349_v38, %v156_v30  ;;  %v174_v53 = vld [vmem:[#allocation3 + $0x3e8] sm:$0xff]  ;;  %v302_v56 = vadd.f32 %v301_v45, %v300_v35  ;;  %v176_v63 = vld [vmem:[#allocation3 + $0x3f8] sm:$0xff]  ;;  %v254_v4 = vadd.f32 %v253_v58, %v252_v46  ;;  %v471_v13 = vsel %vm457_vm0, %v389_v2, %v387_v57  ;;  %v81_v23 = vld [vmem:[#allocation3 + $0x100] sm:$0xff] }
  0x51   :  { %v375_v49 = vadd.f32 %v374_v39, %v170_v31  ;;  %v327_v59 = vrot.slane %v326_v47, 4  ;;  %v278_v0 = vadd.f32 %v277_v55, %v276_v44  ;;  %v59_v31 = vld [vmem:[#allocation3 + $0x50] sm:$0xff]  ;;  %v61_v35 = vld [vmem:[#allocation3 + $0x60] sm:$0xff]  ;;  %v180_v37 = vadd.f32 %v179_v25, %v57_v19 }
  0x52   :  { %v351_v60 = vadd.f32 %v350_v48, %v158_v40  ;;  %v303_v1 = vrot.slane %v302_v56, 2  ;;  %v391_v18 = vmul.f32 0.015625, %v254_v4  ;;  %v85_v36 = vld [vmem:[#allocation3 + $0x120] sm:$0xff]  ;;  %v204_v38 = vadd.f32 %v203_v26, %v69_v20  ;;  %v99_v44 = vld [vmem:[#allocation3 + $0x190] sm:$0xff] }
  0x53   :  { %v376_v61 = vadd.f32 %v375_v49, %v172_v41  ;;  %v328_v5 = vadd.f32 %v327_v59, %v326_v47  ;;  %v279_v11 = vrot.slane %v278_v0, 1  ;;  %v97_v43 = vld [vmem:[#allocation3 + $0x180] sm:$0xff]  ;;  %v229_v45 = vadd.f32 %v83_v24, %v81_v23  ;;  %v63_v48 = vld [vmem:[#allocation3 + $0x70] sm:$0xff] }
  0x54   :  { %v352_v6 = vadd.f32 %v351_v60, %v160_v52  ;;  %v304_v12 = vadd.f32 %v303_v1, %v302_v56  ;;  %v472_v30 = vsel %vm459_vm1, %v391_v18, %v471_v13  ;;  %v75_v49 = vld [vmem:[#allocation3 + $0xd0] sm:$0xff]  ;;  %v181_v51 = vadd.f32 %v180_v37, %v59_v31  ;;  %v101_v56 = vld [vmem:[#allocation3 + $0x1a0] sm:$0xff] }
  0x55   :  { %v377_v7 = vadd.f32 %v376_v61, %v174_v53  ;;  %v329_v15 = vrot.slane %v328_v5, 2  ;;  %v280_v21 = vadd.f32 %v279_v11, %v278_v0  ;;  %v87_v50 = vld [vmem:[#allocation3 + $0x130] sm:$0xff]  ;;  %v205_v52 = vadd.f32 %v204_v38, %v71_v32  ;;  %v113_v57 = vld [vmem:[#allocation3 + $0x200] sm:$0xff] }
  0x56   :  { %v353_v16 = vrot.slane %v352_v6, 4  ;;  %v305_v22 = vrot.slane %v304_v12, 1  ;;  %v115_v58 = vld [vmem:[#allocation3 + $0x210] sm:$0xff]  ;;  %v230_v59 = vadd.f32 %v229_v45, %v85_v36  ;;  %v89_v61 = vld [vmem:[#allocation3 + $0x140] sm:$0xff]  ;;  %v182_v62 = vadd.f32 %v181_v51, %v61_v35 }
  0x57   :  { %v378_v17 = vadd.f32 %v377_v7, %v176_v63  ;;  %v330_v27 = vadd.f32 %v329_v15, %v328_v5  ;;  %v393_v34 = vmul.f32 0.015625, %v280_v21  ;;  %v206_v63 = vadd.f32 %v205_v52, %v73_v42  ;;  %v77_v4 = vld [vmem:[#allocation3 + $0xe0] sm:$0xff]  ;;  %v103_v5 = vld [vmem:[#allocation3 + $0x1b0] sm:$0xff] }
  0x58   :  { %v354_v28 = vadd.f32 %v353_v16, %v352_v6  ;;  %v306_v33 = vadd.f32 %v305_v22, %v304_v12  ;;  %v255_v0 = vadd.f32 %v99_v44, %v97_v43  ;;  %v117_v6 = vld [vmem:[#allocation3 + $0x220] sm:$0xff]  ;;  %v231_v7 = vadd.f32 %v230_v59, %v87_v50  ;;  %v91_v8 = vld [vmem:[#allocation3 + $0x150] sm:$0xff] }
  0x59   :  { %v379_v29 = vrot.slane %v378_v17, 4  ;;  %v331_v39 = vrot.slane %v330_v27, 1  ;;  %v473_v47 = vsel %vm461_vm2, %v393_v34, %v472_v30  ;;  %v129_v9 = vld [vmem:[#allocation3 + $0x280] sm:$0xff]  ;;  %v131_v10 = vld [vmem:[#allocation3 + $0x290] sm:$0xff]  ;;  %v183_v11 = vadd.f32 %v182_v62, %v63_v48 }
  0x5a   :  { %v355_v40 = vrot.slane %v354_v28, 2  ;;  %v395_v46 = vmul.f32 0.015625, %v306_v33  ;;  %v207_v12 = vadd.f32 %v206_v63, %v75_v49  ;;  %v256_v13 = vadd.f32 %v255_v0, %v101_v56  ;;  %v79_v18 = vld [vmem:[#allocation3 + $0xf0] sm:$0xff]  ;;  %v105_v19 = vld [vmem:[#allocation3 + $0x1c0] sm:$0xff] }
  0x5b   :  { %v380_v41 = vadd.f32 %v379_v29, %v378_v17  ;;  %v332_v53 = vadd.f32 %v331_v39, %v330_v27  ;;  %v281_v14 = vadd.f32 %v115_v58, %v113_v57  ;;  %v119_v20 = vld [vmem:[#allocation3 + $0x230] sm:$0xff]  ;;  %v232_v21 = vadd.f32 %v231_v7, %v89_v61  ;;  %v93_v22 = vld [vmem:[#allocation3 + $0x160] sm:$0xff] }
  0x5c   :  { %v356_v54 = vadd.f32 %v355_v40, %v354_v28  ;;  %v474_v60 = vsel %vm463_vm3, %v395_v46, %v473_v47  ;;  %v133_v23 = vld [vmem:[#allocation3 + $0x2a0] sm:$0xff]  ;;  %v184_v24 = vrot.slane %v183_v11, 4  ;;  %v208_v25 = vadd.f32 %v207_v12, %v77_v4  ;;  %v95_v30 = vld [vmem:[#allocation3 + $0x170] sm:$0xff] }
  0x5d   :  { %v381_v55 = vrot.slane %v380_v41, 2  ;;  %v397_v3 = vmul.f32 0.015625, %v332_v53  ;;  %v257_v26 = vadd.f32 %v256_v13, %v103_v5  ;;  %v282_v27 = vadd.f32 %v281_v14, %v117_v6  ;;  %v107_v31 = vld [vmem:[#allocation3 + $0x1d0] sm:$0xff]  ;;  %v121_v32 = vld [vmem:[#allocation3 + $0x240] sm:$0xff] }
  0x5e   :  { %v357_v1 = vrot.slane %v356_v54, 1  ;;  %v233_v33 = vadd.f32 %v232_v21, %v91_v8  ;;  %v307_v34 = vadd.f32 %v131_v10, %v129_v9  ;;  %v135_v35 = vld [vmem:[#allocation3 + $0x2b0] sm:$0xff]  ;;  %v145_v36 = vld [vmem:[#allocation3 + $0x300] sm:$0xff]  ;;  %v185_v38 = vadd.f32 %v184_v24, %v183_v11 }
  0x5f   :  { %v382_v2 = vadd.f32 %v381_v55, %v380_v41  ;;  %v475_v17 = vsel %vm465_vm4, %v397_v3, %v474_v60  ;;  %v147_v37 = vld [vmem:[#allocation3 + $0x310] sm:$0xff]  ;;  %v209_v39 = vadd.f32 %v208_v25, %v79_v18  ;;  %v258_v40 = vadd.f32 %v257_v26, %v105_v19  ;;  %v109_v44 = vld [vmem:[#allocation3 + $0x1e0] sm:$0xff] }
  0x60   :  { %v358_v15 = vadd.f32 %v357_v1, %v356_v54  ;;  %v283_v41 = vadd.f32 %v282_v27, %v119_v20  ;;  %v123_v45 = vld [vmem:[#allocation3 + $0x250] sm:$0xff]  ;;  %v137_v46 = vld [vmem:[#allocation3 + $0x2c0] sm:$0xff]  ;;  %v234_v47 = vadd.f32 %v233_v33, %v93_v22  ;;  %v308_v48 = vadd.f32 %v307_v34, %v133_v23 }
  0x61   :  { %v383_v16 = vrot.slane %v382_v2, 1  ;;  %v149_v49 = vld [vmem:[#allocation3 + $0x320] sm:$0xff]  ;;  %v163_v51 = vld [vmem:[#allocation3 + $0x390] sm:$0xff]  ;;  %v186_v52 = vrot.slane %v185_v38, 2  ;;  %v210_v53 = vrot.slane %v209_v39, 4  ;;  %v259_v54 = vadd.f32 %v258_v40, %v107_v31 }
  0x62   :  { %v399_v29 = vmul.f32 0.015625, %v358_v15  ;;  %v161_v50 = vld [vmem:[#allocation3 + $0x380] sm:$0xff]  ;;  %v284_v55 = vadd.f32 %v283_v41, %v121_v32  ;;  %v111_v57 = vld [vmem:[#allocation3 + $0x1f0] sm:$0xff]  ;;  %v235_v59 = vadd.f32 %v234_v47, %v95_v30  ;;  %v309_v60 = vadd.f32 %v308_v48, %v135_v35 }
  0x63   :  { %v384_v28 = vadd.f32 %v383_v16, %v382_v2  ;;  %v125_v58 = vld [vmem:[#allocation3 + $0x260] sm:$0xff]  ;;  %v333_v61 = vadd.f32 %v147_v37, %v145_v36  ;;  %v139_v62 = vld [vmem:[#allocation3 + $0x2d0] sm:$0xff]  ;;  %v187_v1 = vadd.f32 %v186_v52, %v185_v38  ;;  %v211_v2 = vadd.f32 %v210_v53, %v209_v39 }
  0x64   :  { %v476_v43 = vsel %vm467_vm5, %v399_v29, %v475_v17  ;;  %v151_v63 = vld [vmem:[#allocation3 + $0x330] sm:$0xff]  ;;  %v165_v0 = vld [vmem:[#allocation3 + $0x3a0] sm:$0xff]  ;;  %v260_v3 = vadd.f32 %v259_v54, %v109_v44  ;;  %v285_v4 = vadd.f32 %v284_v55, %v123_v45  ;;  %v236_v6 = vrot.slane %v235_v59, 4 }
  0x65   :  { %v401_v42 = vmul.f32 0.015625, %v384_v28  ;;  %v127_v5 = vld [vmem:[#allocation3 + $0x270] sm:$0xff]  ;;  %v310_v7 = vadd.f32 %v309_v60, %v137_v46  ;;  %v334_v8 = vadd.f32 %v333_v61, %v149_v49  ;;  %v359_v9 = vadd.f32 %v163_v51, %v161_v50  ;;  %v141_v10 = vld [vmem:[#allocation3 + $0x2e0] sm:$0xff] }
  0x66   :  { %v153_v11 = vld [vmem:[#allocation3 + $0x340] sm:$0xff]  ;;  %v167_v12 = vld [vmem:[#allocation3 + $0x3b0] sm:$0xff]  ;;  %v188_v13 = vrot.slane %v187_v1, 1  ;;  %v212_v14 = vrot.slane %v211_v2, 2  ;;  %v261_v15 = vadd.f32 %v260_v3, %v111_v57  ;;  %v286_v16 = vadd.f32 %v285_v4, %v125_v58 }
  0x67   :  { %v477_v56 = vsel %vm469_vm6, %v401_v42, %v476_v43  ;;  %v237_v17 = vadd.f32 %v236_v6, %v235_v59  ;;  %v311_v18 = vadd.f32 %v310_v7, %v139_v62  ;;  %v335_v19 = vadd.f32 %v334_v8, %v151_v63  ;;  %v143_v21 = vld [vmem:[#allocation3 + $0x2f0] sm:$0xff]  ;;  %v169_v23 = vld [vmem:[#allocation3 + $0x3c0] sm:$0xff] }
  0x68   :  { %544 = vmatprep.mubr.f32.mxu0 %v477_v56  ;;  %v360_v20 = vadd.f32 %v359_v9, %v165_v0  ;;  %v155_v22 = vld [vmem:[#allocation3 + $0x350] sm:$0xff]  ;;  %v189_v24 = vadd.f32 %v188_v13, %v187_v1  ;;  %v213_v25 = vadd.f32 %v212_v14, %v211_v2  ;;  %v262_v26 = vrot.slane %v261_v15, 4  ;;  %v157_v32 = vld [vmem:[#allocation3 + $0x360] sm:$0xff] }
  0x69   :  { %v287_v27 = vadd.f32 %v286_v16, %v127_v5  ;;  %v238_v28 = vrot.slane %v237_v17, 2  ;;  %v312_v29 = vadd.f32 %v311_v18, %v141_v10  ;;  %v336_v30 = vadd.f32 %v335_v19, %v153_v11  ;;  %v171_v33 = vld [vmem:[#allocation3 + $0x3d0] sm:$0xff]  ;;  %v173_v42 = vld [vmem:[#allocation3 + $0x3e0] sm:$0xff] }
  0x6a   :  { %v361_v31 = vadd.f32 %v360_v20, %v167_v12  ;;  %v214_v34 = vrot.slane %v213_v25, 1  ;;  %v263_v35 = vadd.f32 %v262_v26, %v261_v15  ;;  %v159_v41 = vld [vmem:[#allocation3 + $0x370] sm:$0xff]  ;;  %v386_v46 = vmul.f32 0.015625, %v189_v24 }
  0x6b   :  { %v288_v36 = vrot.slane %v287_v27, 4  ;;  %v239_v37 = vadd.f32 %v238_v28, %v237_v17  ;;  %v313_v38 = vadd.f32 %v312_v29, %v143_v21  ;;  %v337_v39 = vadd.f32 %v336_v30, %v155_v22  ;;  %v175_v51 = vld [vmem:[#allocation3 + $0x3f0] sm:$0xff] }
  0x6c   :  { %v362_v40 = vadd.f32 %v361_v31, %v169_v23  ;;  %v215_v43 = vadd.f32 %v214_v34, %v213_v25  ;;  %v264_v44 = vrot.slane %v263_v35, 2  ;;  %v613_v31 = vld [vmem:[%s875_s2] ss:$0 sm:$0xff] }
  0x6d   :  { %v289_v45 = vadd.f32 %v288_v36, %v287_v27  ;;  %v240_v47 = vrot.slane %v239_v37, 1  ;;  %v314_v48 = vrot.slane %v313_v38, 4  ;;  %v338_v49 = vadd.f32 %v337_v39, %v157_v32 }
  0x6e   :  { %v363_v50 = vadd.f32 %v362_v40, %v171_v33  ;;  %v265_v52 = vadd.f32 %v264_v44, %v263_v35  ;;  %v388_v54 = vmul.f32 0.015625, %v215_v43 }
  0x6f   :  { %v290_v53 = vrot.slane %v289_v45, 2  ;;  %v241_v55 = vadd.f32 %v240_v47, %v239_v37  ;;  %v315_v56 = vadd.f32 %v314_v48, %v313_v38  ;;  %v339_v57 = vadd.f32 %v338_v49, %v159_v41 }
  0x70   :  { %v364_v58 = vadd.f32 %v363_v50, %v173_v42  ;;  %v266_v59 = vrot.slane %v265_v52, 1  ;;  %v458_v61 = vsel %vm457_vm0, %v388_v54, %v386_v46  ;;  %v577_v54 = vld [vmem:[%s876_s3] sm:$0x1] }
  0x71   :  { %v291_v60 = vadd.f32 %v290_v53, %v289_v45  ;;  %v316_v62 = vrot.slane %v315_v56, 2  ;;  %v340_v63 = vrot.slane %v339_v57, 4  ;;  %v390_v1 = vmul.f32 0.015625, %v241_v55 }
  0x72   :  { %v365_v0 = vadd.f32 %v364_v58, %v175_v51  ;;  %v267_v2 = vadd.f32 %v266_v59, %v265_v52  ;;  %v583_v52 = vlaneseq  ;;  %v579_v58 = vld [vmem:[%s877_s4] sm:$0x1] }
  0x73   :  { %v292_v3 = vrot.slane %v291_v60, 1  ;;  %v317_v4 = vadd.f32 %v316_v62, %v315_v56  ;;  %v341_v5 = vadd.f32 %v340_v63, %v339_v57  ;;  %v460_v7 = vsel %vm459_vm1, %v390_v1, %v458_v61 }
  0x74   :  { %v366_v6 = vrot.slane %v365_v0, 4  ;;  %v392_v9 = vmul.f32 0.015625, %v267_v2  ;;  %v584_v53 = vshrl.u32 %v583_v52, 7 }
  0x75   :  { %v293_v8 = vadd.f32 %v292_v3, %v291_v60  ;;  %v318_v10 = vrot.slane %v317_v4, 1  ;;  %v342_v11 = vrot.slane %v341_v5, 2 }
  0x76   :  { %v367_v12 = vadd.f32 %v366_v6, %v365_v0  ;;  %v462_v14 = vsel %vm461_vm2, %v392_v9, %v460_v7  ;;  %v585_v55 = vsub.s32 0, %v584_v53 }
  0x77   :  { %v394_v13 = vmul.f32 0.015625, %v293_v8  ;;  %v319_v15 = vadd.f32 %v318_v10, %v317_v4  ;;  %v343_v16 = vadd.f32 %v342_v11, %v341_v5 }
  0x78   :  { %v368_v17 = vrot.slane %v367_v12, 2 }
  0x79   :  { %v344_v18 = vrot.slane %v343_v16, 1  ;;  %v396_v20 = vmul.f32 0.015625, %v319_v15  ;;  %v464_v21 = vsel %vm463_vm3, %v394_v13, %v462_v14 }
  0x7a   :  { %v369_v19 = vadd.f32 %v368_v17, %v367_v12 }
  0x7b   :  { %v345_v22 = vadd.f32 %v344_v18, %v343_v16  ;;  %v466_v24 = vsel %vm465_vm4, %v396_v20, %v464_v21 }
  0x7c   :  { %v370_v23 = vrot.slane %v369_v19, 1 }
  0x7d   :  { %v398_v26 = vmul.f32 0.015625, %v345_v22 }
  0x7e   :  { %v371_v25 = vadd.f32 %v370_v23, %v369_v19 }
  0x7f   :  { %v468_v28 = vsel %vm467_vm5, %v398_v26, %v466_v24 }
  0x80   :  { %v400_v27 = vmul.f32 0.015625, %v371_v25 }
  0x82   :  { %v470_v29 = vsel %vm469_vm6, %v400_v27, %v468_v28 }
  0x83   :  { %545 = vmatmul.mubr.f32.vlgmr.msra.gmra.mrb[0].mxu0 %v470_v29 }
 0x156   :  { %v646_v30 = vpop.f32.mrb[0].mxu0 }
 0x157   :  { %v647_v32 = vpop.f32.mrb[1].mxu0 }
 0x158   :  { %v648_v33 = vadd.f32 %v647_v32, %v646_v30 }
 0x15a   :  { %v547_v34 = vadd.f32 %v648_v33, %v613_v31 }
 0x15c   :  { %v558_v35 = vrot.slane %v547_v34, 4 }
 0x15e   :  { %v559_v36 = vadd.f32 %v558_v35, %v547_v34 }
 0x160   :  { %v560_v37 = vrot.slane %v559_v36, 2 }
 0x162   :  { %v561_v38 = vadd.f32 %v560_v37, %v559_v36 }
 0x164   :  { %v562_v39 = vrot.slane %v561_v38, 1 }
 0x166   :  { %v563_v40 = vadd.f32 %v562_v39, %v561_v38 }
 0x168   :  { %v565_v41 = vmul.f32 0.125, %v563_v40 }
 0x16a   :  { %v566_v42 = vsub.f32 %v547_v34, %v565_v41 }
 0x16c   :  { %v567_v43 = vmul.f32 %v566_v42, %v566_v42 }
 0x16e   :  { %v568_v44 = vrot.slane %v567_v43, 4 }
 0x170   :  { %v569_v45 = vadd.f32 %v568_v44, %v567_v43 }
 0x172   :  { %v570_v46 = vrot.slane %v569_v45, 2 }
 0x174   :  { %v571_v47 = vadd.f32 %v570_v46, %v569_v45 }
 0x176   :  { %v572_v48 = vrot.slane %v571_v47, 1 }
 0x178   :  { %v573_v49 = vadd.f32 %v572_v48, %v571_v47 }
 0x17a   :  { %v574_v50 = vmul.f32 0.125, %v573_v49 }
 0x17c   :  { %v575_v51 = vadd.f32 1e-05, %v574_v50 }
 0x17e   :  { %688 = vrsqrt.f32 %v575_v51 }
 0x188   :  { %v689_v56 = vpop.eup %688 }
 0x189   :  { %v578_v57 = vmul.f32 %v689_v56, %v577_v54 }
 0x18b   :  { %v580_v59 = vmul.f32 %v578_v57, %v565_v41  ;;  %v586_v60 = vrot.slane %v578_v57, %v585_v55 }
 0x18d   :  { %v581_v61 = vsub.f32 %v579_v58, %v580_v59  ;;  %v588_v62 = vmul.f32 %v586_v60, %v547_v34 }
 0x18f   :  { %v593_v63 = vrot.slane %v581_v61, %v585_v55 }
 0x191   :  { %v595_v0 = vadd.f32 %v593_v63, %v588_v62 }
 0x193   :  { %596 = vst [vmem:[#allocation8] sm:$0xff] %v595_v0 }
 0x194   :  { %745 = shalt.err (!%p742_p6)
}
 0x195   :  { %s746_s4 = scalar_lea.hbm %s878_s5, 128 }
 0x196   :  { %p747_p7 = scmp.ne.s32.totalorder %s878_s5, %s746_s4  ;;  %p750_p8 = scmp.lt.u32.totalorder %s746_s4, %s878_s5 }
 0x198   :  { %p752_p9 = pnand %p750_p8, %p747_p7 }
 0x19a   :  { %755 = shalt.err (!%p752_p9)
}
 0x19b   :  { %606 = dma.vmem_to_hbm [thread:$0]  %s604_s25, 128, %s878_s5, [#allocation5]  }
 0x19c   :  { %760 = dma.done.wait [#allocation5], 128  }
 0x19d   :  { %761 = vsyncadd [#allocation5], 4294967168 }
 0x19e   :  { %610 = vsyncpa [#allocation4], 1 }
 0x19f   :  { %611 = vsyncpa [#allocation7], 1 }
 0x1a0   :  { %612 = vsyncpa [#allocation5], 1 }

</bundles_post_ra>
